<compile_context>
chip_gen: v7x
topology: tpu7x:2x2x1
jax: 0.10.0
libtpu: 0.0.40
codegen_flags: <defaults>
</compile_context>

<pallas_src>
import functools

import jax
import jax.numpy as jnp
from jax.experimental import pallas as pl
from jax.experimental.pallas import tpu as pltpu

LANE = 128  # vreg lane width (last dim)


def _round_up(n, m):
    return (n + m - 1) // m * m


def _pad2(a, rows, cols, dtype):
    a = jnp.asarray(a, dtype)
    return jnp.pad(a, ((0, rows - a.shape[0]), (0, cols - a.shape[1])))


# --------------------------------------------------------------------------
# Kernel
# --------------------------------------------------------------------------
def sentiment_dnn_kernel(x_ref, w1_ref, b1_ref, w2_ref, b2_ref, w3_ref, b3_ref,
                         o_ref, acc_ref):
    """Grid = (batch tiles [parallel], fc1 K tiles over d_in [arbitrary]).

    fc1 is K-streamed into an f32 VMEM accumulator; at the last K step the
    fc2/fc3 epilogue runs fused and the lane-dense bf16 logits tile is stored.
    """
    k = pl.program_id(1)

    @pl.when(k == 0)
    def _():
        acc_ref[...] = jnp.zeros_like(acc_ref)

    # fc1 partial product (MXU, f32 accumulation).
    acc_ref[...] += jnp.dot(x_ref[...], w1_ref[...],
                            preferred_element_type=jnp.float32)

    @pl.when(k == pl.num_programs(1) - 1)
    def _():
        # fc1 bias + ReLU. dropout(p=0.3) is identity at inference time.
        # TODO(synk): training-mode dropout (pltpu.prng_random_bits mask) not wired in.
        h1 = jnp.maximum(acc_ref[...] + b1_ref[...], 0.0)

        # fc2 + ReLU
        h2 = jnp.dot(h1.astype(w2_ref.dtype), w2_ref[...],
                     preferred_element_type=jnp.float32)
        h2 = jnp.maximum(h2 + b2_ref[...], 0.0)

        # fc3 logits; output block is a full 128-lane slab -> unmasked,
        # lane-dense bf16 store.
        out = jnp.dot(h2.astype(w3_ref.dtype), w3_ref[...],
                      preferred_element_type=jnp.float32)
        o_ref[...] = (out + b3_ref[...]).astype(o_ref.dtype)


# --------------------------------------------------------------------------
# Host-side helpers (all static-shape Python, evaluated at trace time)
# --------------------------------------------------------------------------
def _pick_batch_tile(batch, batch_tile):
    """bf16 rows pack 2 per sublane -> multiples of 16; big tiles amortize the
    ~0.35us per-grid-step overhead; small batches get 2 balanced tiles so both
    v7x TensorCores get work (v5e/v6e are single-TC, unaffected)."""
    target = _round_up(max(batch_tile, 128), 128)
    if batch >= 2 * target:
        return target
    if batch > 16:
        return _round_up((batch + 1) // 2, 16)  # two balanced tiles
    return 16


def _estimate_vmem_bytes(bt, tk, h1_p, h2_p, d_out_p):
    bf16, f32 = 2, 4
    streamed = 2 * bt * tk * bf16          # x tile (double-buffered)
    streamed += 2 * tk * h1_p * bf16       # w1 K tile (double-buffered)
    streamed += 2 * bt * d_out_p * bf16    # out tile (double-buffered)
    resident = 2 * (h1_p * h2_p + h2_p * d_out_p) * bf16   # w2, w3
    resident += 2 * (h1_p + h2_p + d_out_p) * f32          # biases
    scratch = bt * h1_p * f32              # fc1 accumulator
    return streamed + resident + scratch


def _pick_vmem_limit(bytes_needed):
    try:
        phys = pltpu.get_tpu_info().vmem_capacity_bytes
    except Exception:  # pragma: no cover - conservative fallback
        phys = 64 * 1024 * 1024            # v7x per-TC VMEM
    cap = (phys * 3) // 4                  # ~48 MiB on v7x, ~96 MiB on v5e/v6e
    want = int(bytes_needed * 1.5) + (8 << 20)   # headroom for compiler scratch
    return int(max(32 << 20, min(want, cap)))


def prepare_params(w1, b1, w2, b2, w3, b3, *, k_tile=512,
                   param_dtype=jnp.bfloat16):
    """Pads every feature dim to a lane multiple and casts weights to bf16,
    ONCE (hoisted out of the per-call forward). Weights are (in, out) so the
    kernel computes x @ W + b. Zero padding keeps the math exact."""
    d_in, h1 = w1.shape
    h2 = w2.shape[1]
    d_out = w3.shape[1]

    tk = _round_up(min(k_tile, _round_up(d_in, LANE)), LANE)
    d_in_p = _round_up(d_in, tk)           # tk divides d_in_p by construction
    h1_p = _round_up(h1, LANE)
    h2_p = _round_up(h2, LANE)
    d_out_p = _round_up(d_out, LANE)

    padded = (
        _pad2(w1, d_in_p, h1_p, param_dtype),
        _pad2(jnp.reshape(b1, (1, -1)), 1, h1_p, jnp.float32),
        _pad2(w2, h1_p, h2_p, param_dtype),
        _pad2(jnp.reshape(b2, (1, -1)), 1, h2_p, jnp.float32),
        _pad2(w3, h2_p, d_out_p, param_dtype),
        _pad2(jnp.reshape(b3, (1, -1)), 1, d_out_p, jnp.float32),
    )
    meta = dict(d_in=d_in, d_out=d_out, k_tile=tk)
    return padded, meta


# --------------------------------------------------------------------------
# Forward
# --------------------------------------------------------------------------
@functools.partial(jax.jit, static_argnames=("d_out", "k_tile", "batch_tile"))
def sentiment_dnn_forward(x, w1p, b1p, w2p, b2p, w3p, b3p, *, d_out, k_tile,
                          batch_tile=256):
    batch, _ = x.shape
    d_in_p, h1_p = w1p.shape
    h2_p = w2p.shape[1]
    d_out_p = w3p.shape[1]

    bt = _pick_batch_tile(batch, batch_tile)
    batch_p = _round_up(batch, bt)
    num_batch_tiles = batch_p // bt
    num_k_tiles = d_in_p // k_tile

    # Only x is padded per call (it changes every call); zero-padded columns
    # hit zero weight rows, padded batch rows are sliced off below.
    xp = _pad2(x, batch_p, d_in_p, w1p.dtype)

    # Residents: constant index_map -> stay in VMEM across all grid steps.
    resident = lambda shape: pl.BlockSpec(shape, lambda i, k: (0, 0))

    vmem_limit = _pick_vmem_limit(
        _estimate_vmem_bytes(bt, k_tile, h1_p, h2_p, d_out_p))

    out_padded = pl.pallas_call(
        sentiment_dnn_kernel,
        out_shape=jax.ShapeDtypeStruct((batch_p, d_out_p), jnp.bfloat16),
        grid=(num_batch_tiles, num_k_tiles),
        in_specs=[
            pl.BlockSpec((bt, k_tile), lambda i, k: (i, k)),    # x streams
            pl.BlockSpec((k_tile, h1_p), lambda i, k: (k, 0)),  # w1 streams
            resident((1, h1_p)),                                # b1
            resident((h1_p, h2_p)),                             # w2
            resident((1, h2_p)),                                # b2
            resident((h2_p, d_out_p)),                          # w3
            resident((1, d_out_p)),                             # b3
        ],
        out_specs=pl.BlockSpec((bt, d_out_p), lambda i, k: (i, 0)),
        scratch_shapes=[pltpu.VMEM((bt, h1_p), jnp.float32)],   # fc1 accumulator
        compiler_params=pltpu.CompilerParams(
            dimension_semantics=("parallel", "arbitrary"),
            vmem_limit_bytes=vmem_limit,
        ),
    )(xp, w1p, b1p, w2p, b2p, w3p, b3p)

    return out_padded[:batch, :d_out].astype(jnp.float32)


# --------------------------------------------------------------------------
# Reference + init
# --------------------------------------------------------------------------
def init_linear_params(key, fan_in, fan_out):
    """PyTorch nn.Linear default init U[-1/sqrt(fan_in), 1/sqrt(fan_in)];
    weight returned transposed to (fan_in, fan_out) for x @ W layout."""
    kw, kb = jax.random.split(key)
    bound = 1.0 / jnp.sqrt(jnp.float32(fan_in))
    w = jax.random.uniform(kw, (fan_in, fan_out), jnp.float32, -bound, bound)
    b = jax.random.uniform(kb, (1, fan_out), jnp.float32, -bound, bound)
    return w, b


def reference_forward(x, w1, b1, w2, b2, w3, b3, compute_dtype=jnp.float32):
    cd = compute_dtype
    h1 = jnp.dot(x.astype(cd), w1.astype(cd),
                 preferred_element_type=jnp.float32) + b1
    h1 = jnp.maximum(h1, 0.0)
    h2 = jnp.dot(h1.astype(cd), w2.astype(cd),
                 preferred_element_type=jnp.float32) + b2
    h2 = jnp.maximum(h2, 0.0)
    return jnp.dot(h2.astype(cd), w3.astype(cd),
                   preferred_element_type=jnp.float32) + b3


if __name__ == "__main__":
    # Small shapes consistent with the module: 32 TF-IDF-like feature vectors
    # (input_dim=16), hidden_dim=64 (module default), 3 sentiment classes.
    # The small-batch heuristic gives two 16-row tiles -> exercises the
    # multi-tile "parallel" grid (and v7x megacore balance) even at this size.
    batch, input_dim, hidden_dim, output_dim = 32, 16, 64, 3

    key = jax.random.PRNGKey(0)
    kx, k1, k2, k3 = jax.random.split(key, 4)

    x = jax.random.normal(kx, (batch, input_dim), jnp.float32)
    w1, b1 = init_linear_params(k1, input_dim, hidden_dim)
    w2, b2 = init_linear_params(k2, hidden_dim, hidden_dim)
    w3, b3 = init_linear_params(k3, hidden_dim, output_dim)

    # One-time parameter prep (padding + bf16 cast hoisted out of the forward).
    padded, meta = prepare_params(w1, b1, w2, b2, w3, b3)
    padded = jax.block_until_ready(padded)

    out = sentiment_dnn_forward(x, *padded, d_out=meta["d_out"],
                                k_tile=meta["k_tile"])
    out = jax.block_until_ready(out)
    assert out.shape == (batch, output_dim), out.shape

    # Strict check vs. a reference with the same bf16 compute policy (f32
    # accumulation, bf16 logits), plus a loose sanity check vs. full f32.
    ref_bf16 = reference_forward(x, w1, b1, w2, b2, w3, b3,
                                 compute_dtype=jnp.bfloat16)
    ref_q = ref_bf16.astype(jnp.bfloat16).astype(jnp.float32)
    ref_f32 = reference_forward(x, w1, b1, w2, b2, w3, b3,
                                compute_dtype=jnp.float32)
    assert jnp.allclose(out, ref_q, atol=3e-3, rtol=3e-3), \
        "mismatch vs bf16-policy reference"
    assert jnp.allclose(out, ref_f32, atol=1e-1, rtol=5e-2), \
        "mismatch vs f32 reference"

    print("KERNEL_OK")
</pallas_src>

<mosaic_0001>
module attributes {stable_mosaic.version = 11 : i64} {
  func.func @sentiment_dnn_kernel(%arg0: i32, %arg1: i32, %arg2: memref<16x128xbf16, #tpu.memory_space<vmem>>, %arg3: memref<128x128xbf16, #tpu.memory_space<vmem>>, %arg4: memref<1x128xf32, #tpu.memory_space<vmem>>, %arg5: memref<128x128xbf16, #tpu.memory_space<vmem>>, %arg6: memref<1x128xf32, #tpu.memory_space<vmem>>, %arg7: memref<128x128xbf16, #tpu.memory_space<vmem>>, %arg8: memref<1x128xf32, #tpu.memory_space<vmem>>, %arg9: memref<16x128xbf16, #tpu.memory_space<vmem>>, %arg10: memref<16x128xf32, #tpu.memory_space<vmem>>) attributes {dimension_semantics = [#tpu.dimension_semantics<parallel>, #tpu.dimension_semantics<arbitrary>], iteration_bounds = array<i64: 2, 1>, scalar_prefetch = 0 : i64, scratch_operands = 1 : i64, tpu.core_type = #tpu.core_type<tc>, window_params = [{transform_indices = @transform_0, window_bounds = array<i64: 16, 128>}, {transform_indices = @transform_1, window_bounds = array<i64: 128, 128>}, {pipeline_mode = #tpu.pipeline_mode<synchronous>, transform_indices = @transform_2, window_bounds = array<i64: 1, 128>}, {pipeline_mode = #tpu.pipeline_mode<synchronous>, transform_indices = @transform_3, window_bounds = array<i64: 128, 128>}, {pipeline_mode = #tpu.pipeline_mode<synchronous>, transform_indices = @transform_4, window_bounds = array<i64: 1, 128>}, {pipeline_mode = #tpu.pipeline_mode<synchronous>, transform_indices = @transform_5, window_bounds = array<i64: 128, 128>}, {pipeline_mode = #tpu.pipeline_mode<synchronous>, transform_indices = @transform_6, window_bounds = array<i64: 1, 128>}, {transform_indices = @transform_7, window_bounds = array<i64: 16, 128>}]} {
    %c0_i32 = arith.constant 0 : i32
    %0 = arith.cmpi eq, %arg1, %c0_i32 : i32
    %1 = arith.extui %0 : i1 to i32
    %c0_i32_0 = arith.constant 0 : i32
    %2 = arith.cmpi ne, %1, %c0_i32_0 : i32
    scf.if %2 {
      %cst_10 = arith.constant 0.000000e+00 : f32
      %12 = vector.broadcast %cst_10 : f32 to vector<16x128xf32>
      %c0_11 = arith.constant 0 : index
      %c0_12 = arith.constant 0 : index
      %13 = vector.load %arg10[%c0_11, %c0_12] : memref<16x128xf32, #tpu.memory_space<vmem>>, vector<16x128xf32>
      tpu.vector_store %arg10[%c0_11, %c0_12], %12 {strides = array<i32>} : memref<16x128xf32, #tpu.memory_space<vmem>>, vector<16x128xf32>,
    } else {
    }
    %c0 = arith.constant 0 : index
    %c0_1 = arith.constant 0 : index
    %3 = vector.load %arg10[%c0, %c0_1] : memref<16x128xf32, #tpu.memory_space<vmem>>, vector<16x128xf32>
    %c0_2 = arith.constant 0 : index
    %c0_3 = arith.constant 0 : index
    %4 = vector.load %arg2[%c0_2, %c0_3] : memref<16x128xbf16, #tpu.memory_space<vmem>>, vector<16x128xbf16>
    %c0_4 = arith.constant 0 : index
    %c0_5 = arith.constant 0 : index
    %5 = vector.load %arg3[%c0_4, %c0_5] : memref<128x128xbf16, #tpu.memory_space<vmem>>, vector<128x128xbf16>
    %cst = arith.constant dense<0.000000e+00> : vector<16x128xf32>
    %6 = tpu.matmul %4, %5, %cst {dimension_numbers = #tpu.dot_dimension_numbers<[1], [0], [0], [1], [0, 0, 1, 1], [], []>} : vector<16x128xbf16>, vector<128x128xbf16>, vector<16x128xf32> -> vector<16x128xf32>
    %7 = arith.addf %3, %6 : vector<16x128xf32>
    %c0_6 = arith.constant 0 : index
    %c0_7 = arith.constant 0 : index
    %8 = vector.load %arg10[%c0_6, %c0_7] : memref<16x128xf32, #tpu.memory_space<vmem>>, vector<16x128xf32>
    tpu.vector_store %arg10[%c0_6, %c0_7], %7 {strides = array<i32>} : memref<16x128xf32, #tpu.memory_space<vmem>>, vector<16x128xf32>,
    %c0_i32_8 = arith.constant 0 : i32
    %9 = arith.cmpi eq, %arg1, %c0_i32_8 : i32
    %10 = arith.extui %9 : i1 to i32
    %c0_i32_9 = arith.constant 0 : i32
    %11 = arith.cmpi ne, %10, %c0_i32_9 : i32
    scf.if %11 {
      %c0_10 = arith.constant 0 : index
      %c0_11 = arith.constant 0 : index
      %12 = vector.load %arg10[%c0_10, %c0_11] : memref<16x128xf32, #tpu.memory_space<vmem>>, vector<16x128xf32>
      %c0_12 = arith.constant 0 : index
      %c0_13 = arith.constant 0 : index
      %13 = vector.load %arg4[%c0_12, %c0_13] : memref<1x128xf32, #tpu.memory_space<vmem>>, vector<1x128xf32>
      %14 = vector.broadcast %13 : vector<1x128xf32> to vector<16x128xf32>
      %15 = arith.addf %12, %14 : vector<16x128xf32>
      %cst_14 = arith.constant 0.000000e+00 : f32
      %16 = vector.broadcast %cst_14 : f32 to vector<16x128xf32>
      %17 = arith.maximumf %15, %16 : vector<16x128xf32>
      %18 = arith.truncf %17 : vector<16x128xf32> to vector<16x128xbf16>
      %c0_15 = arith.constant 0 : index
      %c0_16 = arith.constant 0 : index
      %19 = vector.load %arg5[%c0_15, %c0_16] : memref<128x128xbf16, #tpu.memory_space<vmem>>, vector<128x128xbf16>
      %cst_17 = arith.constant dense<0.000000e+00> : vector<16x128xf32>
      %20 = tpu.matmul %18, %19, %cst_17 {dimension_numbers = #tpu.dot_dimension_numbers<[1], [0], [0], [1], [0, 0, 1, 1], [], []>} : vector<16x128xbf16>, vector<128x128xbf16>, vector<16x128xf32> -> vector<16x128xf32>
      %c0_18 = arith.constant 0 : index
      %c0_19 = arith.constant 0 : index
      %21 = vector.load %arg6[%c0_18, %c0_19] : memref<1x128xf32, #tpu.memory_space<vmem>>, vector<1x128xf32>
      %22 = vector.broadcast %21 : vector<1x128xf32> to vector<16x128xf32>
      %23 = arith.addf %20, %22 : vector<16x128xf32>
      %cst_20 = arith.constant 0.000000e+00 : f32
      %24 = vector.broadcast %cst_20 : f32 to vector<16x128xf32>
      %25 = arith.maximumf %23, %24 : vector<16x128xf32>
      %26 = arith.truncf %25 : vector<16x128xf32> to vector<16x128xbf16>
      %c0_21 = arith.constant 0 : index
      %c0_22 = arith.constant 0 : index
      %27 = vector.load %arg7[%c0_21, %c0_22] : memref<128x128xbf16, #tpu.memory_space<vmem>>, vector<128x128xbf16>
      %cst_23 = arith.constant dense<0.000000e+00> : vector<16x128xf32>
      %28 = tpu.matmul %26, %27, %cst_23 {dimension_numbers = #tpu.dot_dimension_numbers<[1], [0], [0], [1], [0, 0, 1, 1], [], []>} : vector<16x128xbf16>, vector<128x128xbf16>, vector<16x128xf32> -> vector<16x128xf32>
      %c0_24 = arith.constant 0 : index
      %c0_25 = arith.constant 0 : index
      %29 = vector.load %arg8[%c0_24, %c0_25] : memref<1x128xf32, #tpu.memory_space<vmem>>, vector<1x128xf32>
      %30 = vector.broadcast %29 : vector<1x128xf32> to vector<16x128xf32>
      %31 = arith.addf %28, %30 : vector<16x128xf32>
      %32 = arith.truncf %31 : vector<16x128xf32> to vector<16x128xbf16>
      %c0_26 = arith.constant 0 : index
      %c0_27 = arith.constant 0 : index
      %33 = vector.load %arg9[%c0_26, %c0_27] : memref<16x128xbf16, #tpu.memory_space<vmem>>, vector<16x128xbf16>
      tpu.vector_store %arg9[%c0_26, %c0_27], %32 {strides = array<i32>} : memref<16x128xbf16, #tpu.memory_space<vmem>>, vector<16x128xbf16>,
    } else {
    }
    return
  }
  func.func @transform_0(%arg0: i32, %arg1: i32) -> (i32, i32) {
    %c0_i32 = arith.constant 0 : i32
    return %arg0, %arg1 : i32, i32
  }
  func.func @transform_1(%arg0: i32, %arg1: i32) -> (i32, i32) {
    %c0_i32 = arith.constant 0 : i32
    %c0_i32_0 = arith.constant 0 : i32
    return %arg1, %c0_i32 : i32, i32
  }
  func.func @transform_2(%arg0: i32, %arg1: i32) -> (i32, i32) {
    %c0_i32 = arith.constant 0 : i32
    %c0_i32_0 = arith.constant 0 : i32
    %c0_i32_1 = arith.constant 0 : i32
    return %c0_i32, %c0_i32_0 : i32, i32
  }
  func.func @transform_3(%arg0: i32, %arg1: i32) -> (i32, i32) {
    %c0_i32 = arith.constant 0 : i32
    %c0_i32_0 = arith.constant 0 : i32
    %c0_i32_1 = arith.constant 0 : i32
    return %c0_i32, %c0_i32_0 : i32, i32
  }
  func.func @transform_4(%arg0: i32, %arg1: i32) -> (i32, i32) {
    %c0_i32 = arith.constant 0 : i32
    %c0_i32_0 = arith.constant 0 : i32
    %c0_i32_1 = arith.constant 0 : i32
    return %c0_i32, %c0_i32_0 : i32, i32
  }
  func.func @transform_5(%arg0: i32, %arg1: i32) -> (i32, i32) {
    %c0_i32 = arith.constant 0 : i32
    %c0_i32_0 = arith.constant 0 : i32
    %c0_i32_1 = arith.constant 0 : i32
    return %c0_i32, %c0_i32_0 : i32, i32
  }
  func.func @transform_6(%arg0: i32, %arg1: i32) -> (i32, i32) {
    %c0_i32 = arith.constant 0 : i32
    %c0_i32_0 = arith.constant 0 : i32
    %c0_i32_1 = arith.constant 0 : i32
    return %c0_i32, %c0_i32_0 : i32, i32
  }
  func.func @transform_7(%arg0: i32, %arg1: i32) -> (i32, i32) {
    %c0_i32 = arith.constant 0 : i32
    %c0_i32_0 = arith.constant 0 : i32
    return %arg0, %c0_i32 : i32, i32
  }
}

</mosaic_0001>

<bundles_post_ra>
// kernel: sentiment_dnn_forward.1
= control target key start
LH: loop header
LB: loop body
LE: loop exit
PB: predicated region body
PF: predicated region fallthrough
CT: control target
= control target key end

     0   :  { %12 = vsyncpa [#allocation4], 0  ;;  %s1375_s0 = inlined_call_operand.vmem [shape: bf16[32,128], index: 0, kind: input, shape index: {}]   ;;  %s1376_s1 = inlined_call_operand.vmem [shape: bf16[128,128], index: 1, kind: input, shape index: {}]   ;;  %s1377_s2 = inlined_call_operand.vmem [shape: f32[1,128], index: 2, kind: input, shape index: {}]   ;;  %s1378_s3 = inlined_call_operand.hbm [shape: bf16[128,128], index: 3, kind: input, shape index: {}]   ;;  %s1379_s4 = inlined_call_operand.vmem [shape: f32[1,128], index: 4, kind: input, shape index: {}]   ;;  %s1380_s5 = inlined_call_operand.hbm [shape: bf16[128,128], index: 5, kind: input, shape index: {}]   ;;  %s1381_s6 = inlined_call_operand.vmem [shape: f32[1,128], index: 6, kind: input, shape index: {}]   ;;  %s1382_s7 = inlined_call_operand.vmem [shape: bf16[32,128], index: 7, kind: output, shape index: {}]  }
   0x1   :  { %13 = vsyncpa [#allocation6], 0  ;;  %s1190_s24 = smov 0   ;;  %s1192_s25 = smov 0  }
   0x2   :  { %s1194_s26 = smov 0  }
   0x3 LB: > { %s842_s27 = sadd.s32 4294967295, %s1142_s26   ;;  %s31_s28 = sadd.s32 1, %s1138_s25  ;;  %s1142_s26 = sphi %s1194_s26, %s19_s26   ;;  %s1138_s25 = sphi %s1192_s25, %s1392_s25   ;;  %s1134_s24 = sphi %s1190_s24, %s1391_s24  }
   0x4   : > { %p33_p0 = scmp.ge.s32.totalorder %s31_s28, 2  ;;  %p844_p1 = scmp.ge.s32.totalorder %s1142_s26, 1 }
   0x5   : > { %p221_p2 = scmp.lt.s32.totalorder %s1142_s26, 3  ;;  %p1215_p4 = scmp.eq.s32.totalorder %s842_s27, 0 }
   0x6   : > { %s1394_s28 = smov (%p33_p0, %s31_s28), 0  ;;  %s1144_s8 = smov [#allocation3]  }
   0x7   : > { %p1211_p3 = pnand %p844_p1, %p221_p2  ;;  %s245_s9 = sshll.u32 %s1144_s8, 4  ;;  %s246_s9 = int_to_ptr.vmem [resolvable:$true] %s245_s9 }
   0x8   : > { %s1387_s30 = scalar_select %p1215_p4, 1, 0 }
   0x9   : > { %s1386_s29 = scalar_select %p1211_p3, 1, 0 }
   0xa   : > { %p990_p5 = pneg %p1211_p3  ;;  %s1145_s11 = smov [#allocation5]  }
   0xb   : > { %s261_s12 = sshll.u32 %s1145_s11, 4  ;;  %s1056_s15 = scalar_lea.hbm %s1378_s3, 1024  ;;  %s1227_s12 = int_to_ptr.vmem [resolvable:$true] %s261_s12 }
   0xc   : > { %p1223_p6 = pnand %p1215_p4, %p990_p5  ;;  %p1057_p7 = scmp.ne.s32.totalorder %s1378_s3, %s1056_s15 }
   0xd   : > { %p1063_p11 = scmp.lt.u32.totalorder %s1056_s15, %s1378_s3 }
   0xe   : > { %p1058_p8 = pneg %p1223_p6 }
  0x10   : > { %p1059_p9 = pnand %p1058_p8, %p1057_p7 }
  0x12   : > { %p1060_p10 = pneg %p1059_p9 }
  0x14   : > { %p1065_p12 = pnand %p1063_p11, %p1060_p10 }
  0x16   : > { %1068 = shalt.err (!%p1065_p12)
}
  0x17   : > { %s1069_s20 = scalar_lea.vmem %s246_s9, 1024  ;;  %p1077_p2 = scmp.lt.s32.totalorder %s246_s9, %s246_s9 }
  0x18   : > { %p1070_p13 = scmp.ne.s32.totalorder %s246_s9, %s1069_s20  ;;  %p1078_p5 = scmp.lt.s32.totalorder %s1069_s20, %s1069_s20 }
  0x1a   : > { %p1072_p0 = pnand %p1070_p13, %p1058_p8  ;;  %p1079_p4 = por %p1078_p5, %p1077_p2 }
  0x1c   : > { %p1073_p1 = pneg %p1072_p0 }
  0x1e   : > { %p1080_p3 = pnand %p1079_p4, %p1073_p1 }
  0x20   : > { %1083 = shalt.err (!%p1080_p3)
}
  0x21   : > { %s1146_s21 = smov 64   ;;  %s1147_s22 = smov 4  }
  0x22   : > { %993 = dma.hbm_to_vmem [thread:$0]  (!%p1223_p6), %s1378_s3, 1024, %s246_s9, [#allocation4], %s1146_s21, %s1146_s21, %s1147_s22  }
  0x23   : > { %s1084_s13 = scalar_lea.hbm %s1380_s5, 1024 }
  0x24   : > { %p1085_p7 = scmp.ne.s32.totalorder %s1380_s5, %s1084_s13  ;;  %p1091_p9 = scmp.lt.u32.totalorder %s1084_s13, %s1380_s5 }
  0x26   : > { %p1087_p3 = pnand %p1085_p7, %p1058_p8 }
  0x28   : > { %p1088_p4 = pneg %p1087_p3 }
  0x2a   : > { %p1093_p10 = pnand %p1091_p9, %p1088_p4 }
  0x2c   : > { %1096 = shalt.err (!%p1093_p10)
}
  0x2d   : > { %s1097_s9 = scalar_lea.vmem %s1227_s12, 1024  ;;  %p1105_p0 = scmp.lt.s32.totalorder %s1227_s12, %s1227_s12 }
  0x2e   : > { %p1098_p11 = scmp.ne.s32.totalorder %s1227_s12, %s1097_s9  ;;  %p1106_p1 = scmp.lt.s32.totalorder %s1097_s9, %s1097_s9 }
  0x30   : > { %p1100_p12 = pnand %p1098_p11, %p1058_p8  ;;  %p1107_p2 = por %p1106_p1, %p1105_p0 }
  0x32   : > { %p1101_p13 = pneg %p1100_p12 }
  0x34   : > { %p1108_p5 = pnand %p1107_p2, %p1101_p13 }
  0x36   : > { %1111 = shalt.err (!%p1108_p5)
}
  0x37   : > { %996 = dma.hbm_to_vmem [thread:$0]  (!%p1223_p6), %s1380_s5, 1024, %s1227_s12, [#allocation6], %s1146_s21, %s1146_s21, %s1147_s22  }
  0x38   : > { %p1389_p7 = scmp.ne.s32.totalorder %s1386_s29, 0 }
  0x39   : > { %p1390_p3 = scmp.ne.s32.totalorder (!%p1389_p7), %s1387_s30, 0 }
  0x3a   : > { %292 = sbr.rel (%p1389_p7) target bundleno = 761 (0x2f9), region = 48 }
  0x41   : > { %1125 = dma.done.wait (%p1390_p3), [#allocation4], 1024  }
  0x42   : > { %1127 = vsyncadd (%p1390_p3), [#allocation4], 4294966272 }
  0x43   : > { %1129 = dma.done.wait (%p1390_p3), [#allocation6], 1024  }
  0x44   : > { %1131 = vsyncadd (%p1390_p3), [#allocation6], 4294966272  ;;  %s852_s10 = sshll.u32 %s1134_s24, 1  ;;  %v1148_v0 = vmov 0.0   ;;  %vm1149_vm0 = vmmov 0   ;;  %v1031_v1 = vld [vmem:[%s1376_s1] sm:$0xff]  }
  0x45   : > { %922 = vmatprep.subr.bf16.mxu0 %v1148_v0  ;;  %938 = vmatprep.mubr.msk.bf16.mxu0 %vm1149_vm0, %v1148_v0  ;;  %p337_p6 = scmp.lt.s32.totalorder %s852_s10, 3  ;;  %v1032_v2 = vld [vmem:[%s1376_s1 + $0x8] sm:$0xff]   ;;  %v1033_v3 = vld [vmem:[%s1376_s1 + $0x10] sm:$0xff]   ;;  %v1040_v4 = vld [vmem:[#allocation3] sm:$0xff]  }
  0x46   : > { %942 = vmatprep.subr.bf16.mxu1 %v1148_v0  ;;  %958 = vmatprep.mubr.msk.bf16.mxu1 %vm1149_vm0, %v1148_v0  ;;  %v1034_v5 = vld [vmem:[%s1376_s1 + $0x18] sm:$0xff]   ;;  %v1041_v6 = vld [vmem:[#allocation3 + $0x8] sm:$0xff]   ;;  %v1035_v7 = vld [vmem:[%s1376_s1 + $0x20] sm:$0xff]  }
  0x47   : > { %s1396_s10 = smov (!%p337_p6, %s852_s10), 3  ;;  %923 = vmatpush3.bf16.msra.mxu0 %v1031_v1  ;;  %943 = vmatpush3.bf16.msra.mxu1 %v1040_v4  ;;  %v1042_v8 = vld [vmem:[#allocation3 + $0x10] sm:$0xff]   ;;  %v1036_v9 = vld [vmem:[%s1376_s1 + $0x28] sm:$0xff]   ;;  %v1043_v10 = vld [vmem:[#allocation3 + $0x18] sm:$0xff]  }
  0x48   : > { %924 = vmatprep.subr.bf16.mxu0 %v1148_v0  ;;  %s853_s20 = sshll.u32 %s1396_s10, 2  ;;  %944 = vmatprep.subr.bf16.mxu1 %v1148_v0  ;;  %v1037_v11 = vld [vmem:[%s1376_s1 + $0x30] sm:$0xff]   ;;  %v1044_v12 = vld [vmem:[#allocation3 + $0x20] sm:$0xff]   ;;  %v1038_v13 = vld [vmem:[%s1376_s1 + $0x38] sm:$0xff]  }
  0x49   : > { %s1312_s8 = scalar_lea.vmem %s1375_s0, %s853_s20  ;;  %v1045_v14 = vld [vmem:[#allocation3 + $0x28] sm:$0xff]   ;;  %v1046_v16 = vld [vmem:[#allocation3 + $0x30] sm:$0xff]   ;;  %v1047_v17 = vld [vmem:[#allocation3 + $0x38] sm:$0xff]   ;;  %s355_s11 = scalar_lea.vmem %s1382_s7, %s853_s20 }
  0x4a   : > { %v1039_v15 = vld [vmem:[%s1312_s8] sm:$0xff]   ;;  %v1049_v19 = vld [vmem:[#allocation5 + $0x8] sm:$0xff]   ;;  %v1050_v20 = vld [vmem:[#allocation5 + $0x10] sm:$0xff]  }
  0x4b   : > { %925 = vmatpush3.bf16.msra.mxu0 %v1032_v2  ;;  %945 = vmatpush3.bf16.msra.mxu1 %v1041_v6  ;;  %v1048_v18 = vld [vmem:[#allocation5] sm:$0xff]   ;;  %v1051_v21 = vld [vmem:[#allocation5 + $0x18] sm:$0xff]   ;;  %v1053_v23 = vld [vmem:[#allocation5 + $0x28] sm:$0xff]  }
  0x4c   : > { %926 = vmatprep.subr.bf16.mxu0 %v1148_v0  ;;  %946 = vmatprep.subr.bf16.mxu1 %v1148_v0  ;;  %v1052_v22 = vld [vmem:[#allocation5 + $0x20] sm:$0xff]   ;;  %v1054_v34 = vld [vmem:[#allocation5 + $0x30] sm:$0xff]   ;;  %v1055_v35 = vld [vmem:[#allocation5 + $0x38] sm:$0xff]  }
  0x4d   : > { %v865_v24 = vld [vmem:[%s1377_s2] ss:$0 sm:$0xff] }
  0x4e   : > { %v866_v36 = vld [vmem:[%s1379_s4] ss:$0 sm:$0xff] }
  0x4f   : > { %927 = vmatpush3.bf16.msra.mxu0 %v1033_v3  ;;  %947 = vmatpush3.bf16.msra.mxu1 %v1042_v8  ;;  %v875_v46 = vld [vmem:[%s1381_s6] ss:$0 sm:$0xff] }
  0x50   : > { %928 = vmatprep.subr.bf16.mxu0 %v1148_v0  ;;  %948 = vmatprep.subr.bf16.mxu1 %v1148_v0 }
  0x53   : > { %929 = vmatpush3.bf16.msra.mxu0 %v1034_v5  ;;  %949 = vmatpush3.bf16.msra.mxu1 %v1043_v10 }
  0x54   : > { %930 = vmatprep.subr.bf16.mxu0 %v1148_v0  ;;  %950 = vmatprep.subr.bf16.mxu1 %v1148_v0 }
  0x57   : > { %931 = vmatpush3.bf16.msra.mxu0 %v1035_v7  ;;  %951 = vmatpush3.bf16.msra.mxu1 %v1044_v12 }
  0x58   : > { %932 = vmatprep.subr.bf16.mxu0 %v1148_v0  ;;  %952 = vmatprep.subr.bf16.mxu1 %v1148_v0 }
  0x5b   : > { %933 = vmatpush3.bf16.msra.mxu0 %v1036_v9  ;;  %953 = vmatpush3.bf16.msra.mxu1 %v1045_v14 }
  0x5c   : > { %934 = vmatprep.subr.bf16.mxu0 %v1148_v0  ;;  %954 = vmatprep.subr.bf16.mxu1 %v1148_v0 }
  0x5f   : > { %935 = vmatpush3.bf16.msra.mxu0 %v1037_v11  ;;  %955 = vmatpush3.bf16.msra.mxu1 %v1046_v16 }
  0x60   : > { %936 = vmatprep.subr.bf16.mxu0 %v1148_v0  ;;  %956 = vmatprep.subr.bf16.mxu1 %v1148_v0 }
  0x63   : > { %937 = vmatpush3.bf16.msra.mxu0 %v1038_v13  ;;  %957 = vmatpush3.bf16.msra.mxu1 %v1047_v17 }
  0x64   : > { %962 = vmatprep.subr.bf16.mxu0 %v1148_v0 }
  0x66   : > { %939 = vmatmul.mubr.bf16.vlgmr.msra.gmra.mrb[0].mxu0 %v1039_v15 }
  0x67   : > { %978 = vmatprep.mubr.msk.bf16.mxu0 %vm1149_vm0, %v1148_v0  ;;  %963 = vmatpush3.bf16.msra.mxu0 %v1048_v18 }
  0x68   : > { %964 = vmatprep.subr.bf16.mxu0 %v1148_v0 }
  0x6b   : > { %965 = vmatpush3.bf16.msra.mxu0 %v1049_v19 }
  0x6c   : > { %966 = vmatprep.subr.bf16.mxu0 %v1148_v0 }
  0x6f   : > { %967 = vmatpush3.bf16.msra.mxu0 %v1050_v20 }
  0x70   : > { %968 = vmatprep.subr.bf16.mxu0 %v1148_v0 }
  0x73   : > { %969 = vmatpush3.bf16.msra.mxu0 %v1051_v21 }
  0x74   : > { %970 = vmatprep.subr.bf16.mxu0 %v1148_v0 }
  0x77   : > { %971 = vmatpush3.bf16.msra.mxu0 %v1052_v22 }
  0x78   : > { %972 = vmatprep.subr.bf16.mxu0 %v1148_v0 }
  0x7b   : > { %973 = vmatpush3.bf16.msra.mxu0 %v1053_v23 }
  0x7c   : > { %974 = vmatprep.subr.bf16.mxu0 %v1148_v0 }
  0x7f   : > { %975 = vmatpush3.bf16.msra.mxu0 %v1054_v34 }
  0x80   : > { %976 = vmatprep.subr.bf16.mxu0 %v1148_v0 }
  0x83   : > { %977 = vmatpush3.bf16.msra.mxu0 %v1055_v35 }
 0x139   : > { %v472_v25 = vpop.f32.mrb[0].mxu0 }
 0x13a   : > { %v495_v26 = vadd.f32 %v865_v24, %v472_v25  ;;  %v940_v27 = vpop.f32.mrb[1].mxu0 }
 0x13b   : > { %v475_v28 = vpop.f32.mrb[2].mxu0 }
 0x13c   : > { %v496_v29 = vadd.f32 %v865_v24, %v475_v28  ;;  %v941_v30 = vpop.f32.mrb[3].mxu0  ;;  %v497_v31 = vmax.f32 %v495_v26, 0.0 }
 0x13e   : > { %v498_v32 = vmax.f32 %v496_v29, 0.0 }
 0x140   : > { %v499_v33 = vpack.c.bf16 %v498_v32, %v497_v31 }
 0x142   : > { %959 = vmatmul.mubr.bf16.vlgmr.msra.gmra.mrb[0].mxu1 %v499_v33 }
 0x215   : > { %v605_v37 = vpop.f32.mrb[0].mxu1 }
 0x216   : > { %v606_v38 = vadd.f32 %v866_v36, %v605_v37  ;;  %v960_v39 = vpop.f32.mrb[1].mxu1 }
 0x217   : > { %v608_v40 = vpop.f32.mrb[2].mxu1 }
 0x218   : > { %v609_v41 = vadd.f32 %v866_v36, %v608_v40  ;;  %v961_v42 = vpop.f32.mrb[3].mxu1  ;;  %v612_v43 = vmax.f32 %v606_v38, 0.0 }
 0x21a   : > { %v613_v44 = vmax.f32 %v609_v41, 0.0 }
 0x21c   : > { %v614_v45 = vpack.c.bf16 %v613_v44, %v612_v43 }
 0x21e   : > { %979 = vmatmul.mubr.bf16.vlgmr.msra.gmra.mrb[4].mxu0 %v614_v45 }
 0x2f1   : > { %v720_v47 = vpop.f32.mrb[4].mxu0 }
 0x2f2   : > { %v980_v48 = vpop.f32.mrb[5].mxu0  ;;  %v721_v50 = vadd.f32 %v875_v46, %v720_v47 }
 0x2f3   : > { %v723_v49 = vpop.f32.mrb[6].mxu0 }
 0x2f4   : > { %v724_v51 = vadd.f32 %v875_v46, %v723_v49  ;;  %v981_v52 = vpop.f32.mrb[7].mxu0 }
 0x2f6   : > { %v893_v53 = vpack.c.bf16 %v724_v51, %v721_v50 }
 0x2f8   : > { %894 = vst [vmem:[%s355_s11] sm:$0xff] %v893_v53  }
 0x2f9 PF: > { %s19_s26 = sadd.s32 1, %s1142_s26   ;;  %s1391_s24 = smov %s1138_s25 }
 0x2fa   : > { %p16_p8 = scmp.ge.s32.totalorder %s19_s26, 4   ;;  %s1392_s25 = smov %s1394_s28 }
 0x2fc   :  { %18 = sbr.rel (!%p16_p8) target bundleno = 3 (0x3), region = 98 }
 0x303   :  { %759 = vsyncpa [#allocation4], 1 }
 0x304   :  { %761 = vsyncpa [#allocation4 + $0x1], 1 }
 0x305   :  { %762 = vsyncpa [#allocation6], 1 }

</bundles_post_ra>
